<compile_context>
chip_gen: v5e
topology: v5e:2x2
jax: 0.10.0
libtpu: 0.0.40
codegen_flags: <defaults>
</compile_context>

<pallas_src>
import functools
import math

import jax
import jax.numpy as jnp
from jax.experimental import pallas as pl
from jax.experimental.pallas import tpu as pltpu


def _round_up(x, m):
    return ((x + m - 1) // m) * m


# ----------------------------------------------------------------------------
# VMEM budgeting (bytes-based cutoff instead of a hard-coded N threshold).
# ----------------------------------------------------------------------------
FUSED_VMEM_BUDGET = 40 * 1024 * 1024   # safe under v7x's 64 MiB physical VMEM


def _fused_vmem_bytes(n_p, fin_p, hid_p, out_p):
    """Rough VMEM estimate for the fully fused kernel (2x = double-buffering)."""
    in_bytes = 2 * (n_p * fin_p * 2          # x  (bf16)
                    + n_p * n_p * 2          # adj (bf16)
                    + fin_p * hid_p * 2      # w1 (bf16)
                    + hid_p * out_p * 2      # w2 (bf16)
                    + (hid_p + out_p) * 4)   # biases (f32)
    out_bytes = 2 * n_p * out_p * 4          # output (f32)
    interm = n_p * hid_p * 4 * 2 + n_p * out_p * 4   # s1, h, s2 (f32 vregs/VMEM)
    return in_bytes + out_bytes + interm


# ----------------------------------------------------------------------------
# Kernel 1: fully fused 2-layer GCN for small problems (everything in VMEM).
#   h   = relu(adj @ (x @ W_sum) + b_sum)
#   out = adj @ (h @ w8) + b8
# ----------------------------------------------------------------------------
def _gcn_fused_kernel(x_ref, adj_ref, w1_ref, b1_ref, w2_ref, b2_ref, o_ref):
    adj = adj_ref[...]                                            # bf16
    s1 = jnp.dot(x_ref[...], w1_ref[...],
                 preferred_element_type=jnp.float32)
    h = jnp.dot(adj, s1.astype(jnp.bfloat16),
                preferred_element_type=jnp.float32) + b1_ref[...]
    h = jnp.maximum(h, 0.0)
    s2 = jnp.dot(h.astype(jnp.bfloat16), w2_ref[...],
                 preferred_element_type=jnp.float32)
    o_ref[...] = (jnp.dot(adj, s2.astype(jnp.bfloat16),
                          preferred_element_type=jnp.float32)
                  + b2_ref[...]).astype(o_ref.dtype)


def gcn_forward_fused(x, adj, w1, b1, w2, b2):
    n, fin = x.shape
    hid = w1.shape[1]
    fout = w2.shape[1]

    # Lane-dense padding (last dims -> multiples of 128, rows -> multiple of 8).
    n_p = _round_up(max(n, 8), 8)
    fin_p = _round_up(fin, 128)
    hid_p = _round_up(hid, 128)
    out_p = _round_up(fout, 128)

    bf = jnp.bfloat16
    x_p = jnp.zeros((n_p, fin_p), bf).at[:n, :fin].set(x.astype(bf))
    adj_p = jnp.zeros((n_p, n_p), bf).at[:n, :n].set(adj.astype(bf))
    w1_p = jnp.zeros((fin_p, hid_p), bf).at[:fin, :hid].set(w1.astype(bf))
    b1_p = jnp.zeros((1, hid_p), jnp.float32).at[0, :hid].set(b1)
    w2_p = jnp.zeros((hid_p, out_p), bf).at[:hid, :fout].set(w2.astype(bf))
    b2_p = jnp.zeros((1, out_p), jnp.float32).at[0, :fout].set(b2)

    vmem_limit = int(min(max(32 << 20,
                             _fused_vmem_bytes(n_p, fin_p, hid_p, out_p)
                             + (4 << 20)),
                         56 << 20))

    # TODO(synk): for n_p in the multi-thousand range a row-tiled layer-1 grid
    # would overlap the initial adj DMA with MXU work; at the bytes-based
    # cutoff used here the exposed startup DMA is negligible.
    out_padded = pl.pallas_call(
        _gcn_fused_kernel,
        out_shape=jax.ShapeDtypeStruct((n_p, out_p), jnp.float32),
        grid_spec=pltpu.PrefetchScalarGridSpec(
            num_scalar_prefetch=0,
            grid=(1,),
            in_specs=[
                pl.BlockSpec((n_p, fin_p), lambda i: (0, 0)),
                pl.BlockSpec((n_p, n_p), lambda i: (0, 0)),
                pl.BlockSpec((fin_p, hid_p), lambda i: (0, 0)),
                pl.BlockSpec((1, hid_p), lambda i: (0, 0)),
                pl.BlockSpec((hid_p, out_p), lambda i: (0, 0)),
                pl.BlockSpec((1, out_p), lambda i: (0, 0)),
            ],
            out_specs=pl.BlockSpec((n_p, out_p), lambda i: (0, 0)),
        ),
        compiler_params=pltpu.CompilerParams(
            dimension_semantics=("arbitrary",),
            vmem_limit_bytes=vmem_limit,
        ),
    )(x_p, adj_p, w1_p, b1_p, w2_p, b2_p)
    return out_padded[:n, :fout]


# ----------------------------------------------------------------------------
# Kernel 2: K-tiled adjacency matmul for large N.
#   out[rows] = maybe_relu( sum_k adj[rows, k_tile] @ supp[k_tile, :] + b )
# support (= x @ W) is computed OUTSIDE this kernel, so every row tile is
# independent -> the row axis is "parallel" (v7x megacore) and VMEM is bounded.
# ----------------------------------------------------------------------------
def _adj_matmul_kernel(adj_ref, supp_ref, b_ref, o_ref, acc_ref, *, apply_relu):
    k = pl.program_id(1)

    @pl.when(k == 0)
    def _():
        acc_ref[...] = jnp.zeros_like(acc_ref)

    acc_ref[...] += jnp.dot(adj_ref[...], supp_ref[...],
                            preferred_element_type=jnp.float32)

    @pl.when(k == pl.num_programs(1) - 1)
    def _():
        out = acc_ref[...] + b_ref[...]
        if apply_relu:
            out = jnp.maximum(out, 0.0)
        o_ref[...] = out.astype(o_ref.dtype)


def gcn_layer_tiled(adj_p, supp_p, b_p, *, apply_relu, out_dtype,
                    row_tile=256, k_tile=512):
    """adj_p: (n_p, n_p) bf16 (already padded), supp_p: (n_p, fout_p) bf16,
    b_p: (1, fout_p) f32.  Returns (n_p, fout_p) in out_dtype."""
    n_p, fout_p = supp_p.shape
    assert adj_p.shape == (n_p, n_p)
    assert n_p % row_tile == 0 and n_p % k_tile == 0

    out_itemsize = jnp.dtype(out_dtype).itemsize
    vmem_bytes = (2 * row_tile * k_tile * 2          # adj tiles (double-buffered)
                  + 2 * k_tile * fout_p * 2          # supp tiles
                  + 2 * fout_p * 4                   # bias
                  + 2 * row_tile * fout_p * out_itemsize
                  + row_tile * fout_p * 4)           # f32 accumulator scratch
    vmem_limit = int(min(max(32 << 20, 2 * vmem_bytes), 64 << 20))

    kernel = functools.partial(_adj_matmul_kernel, apply_relu=apply_relu)

    # Note: only adj/supp actually stream; if DMA shows up exposed in a trace,
    # bump their specs to pipeline_mode=pl.Buffered(3) (tiles are cheap now).
    return pl.pallas_call(
        kernel,
        out_shape=jax.ShapeDtypeStruct((n_p, fout_p), out_dtype),
        grid_spec=pltpu.PrefetchScalarGridSpec(
            num_scalar_prefetch=0,
            grid=(n_p // row_tile, n_p // k_tile),
            in_specs=[
                pl.BlockSpec((row_tile, k_tile), lambda i, k: (i, k)),   # adj
                pl.BlockSpec((k_tile, fout_p), lambda i, k: (k, 0)),     # supp
                pl.BlockSpec((1, fout_p), lambda i, k: (0, 0)),          # bias
            ],
            out_specs=pl.BlockSpec((row_tile, fout_p), lambda i, k: (i, 0)),
            scratch_shapes=[pltpu.VMEM((row_tile, fout_p), jnp.float32)],
        ),
        compiler_params=pltpu.CompilerParams(
            dimension_semantics=("parallel", "arbitrary"),
            vmem_limit_bytes=vmem_limit,
        ),
    )(adj_p, supp_p, b_p)


def gcn_forward_tiled(x, adj, w1, b1, w2, b2, *, row_tile=256, k_tile=512):
    """Two GCN layers via the K-tiled adjacency kernel (large-N path)."""
    n, fin = x.shape
    hid = w1.shape[1]
    fout = w2.shape[1]

    bf = jnp.bfloat16
    tile_lcm = math.lcm(row_tile, k_tile)
    n_p = _round_up(max(n, tile_lcm), tile_lcm)
    fin_p = _round_up(fin, 128)
    hid_p = _round_up(hid, 128)
    out_p = _round_up(fout, 128)

    # adj padded + cast ONCE and reused by both layers; h never leaves padded
    # form between the layers.
    adj_p = jnp.zeros((n_p, n_p), bf).at[:n, :n].set(adj.astype(bf))
    x_p = jnp.zeros((n_p, fin_p), bf).at[:n, :fin].set(x.astype(bf))
    w1_p = jnp.zeros((fin_p, hid_p), bf).at[:fin, :hid].set(w1.astype(bf))
    b1_p = jnp.zeros((1, hid_p), jnp.float32).at[0, :hid].set(b1)
    w2_p = jnp.zeros((hid_p, out_p), bf).at[:hid, :fout].set(w2.astype(bf))
    b2_p = jnp.zeros((1, out_p), jnp.float32).at[0, :fout].set(b2)

    # Support matmuls hoisted out of the Pallas kernel (tiny vs. the N^2 adj
    # matmul; keeps the row axis parallel and the kernel's VMEM bounded).
    supp1 = jnp.dot(x_p, w1_p, preferred_element_type=jnp.float32).astype(bf)
    h_p = gcn_layer_tiled(adj_p, supp1, b1_p, apply_relu=True,
                          out_dtype=bf, row_tile=row_tile, k_tile=k_tile)

    supp2 = jnp.dot(h_p, w2_p, preferred_element_type=jnp.float32).astype(bf)
    out_padded = gcn_layer_tiled(adj_p, supp2, b2_p, apply_relu=False,
                                 out_dtype=jnp.float32,
                                 row_tile=row_tile, k_tile=k_tile)
    return out_padded[:n, :fout]


# ----------------------------------------------------------------------------
# Full GCN forward (eval-mode dropout == identity)
# ----------------------------------------------------------------------------
@jax.jit
def gcn_forward(inputs, adj, params):
    w_stack, b_stack, w8, b8 = params
    # Collapse the 7 branches (exact in eval mode): one tiny XLA reduce.
    w_sum = jnp.sum(w_stack, axis=0)
    b_sum = jnp.sum(b_stack, axis=0)

    n, fin = inputs.shape
    hid = w_sum.shape[1]
    fout = w8.shape[1]
    n_p = _round_up(max(n, 8), 8)
    fin_p = _round_up(fin, 128)
    hid_p = _round_up(hid, 128)
    out_p = _round_up(fout, 128)

    if _fused_vmem_bytes(n_p, fin_p, hid_p, out_p) <= FUSED_VMEM_BUDGET:
        return gcn_forward_fused(inputs, adj, w_sum, b_sum, w8, b8)
    return gcn_forward_tiled(inputs, adj, w_sum, b_sum, w8, b8)


def init_params(key, in_dim, hidden_dim, out_dim):
    """pygcn GraphConvolution init: U(-1/sqrt(fan_out), 1/sqrt(fan_out))."""
    keys = jax.random.split(key, 4)
    stdv_h = 1.0 / jnp.sqrt(hidden_dim)
    stdv_o = 1.0 / jnp.sqrt(out_dim)
    w_stack = jax.random.uniform(keys[0], (7, in_dim, hidden_dim),
                                 minval=-stdv_h, maxval=stdv_h,
                                 dtype=jnp.float32)
    b_stack = jax.random.uniform(keys[1], (7, hidden_dim),
                                 minval=-stdv_h, maxval=stdv_h,
                                 dtype=jnp.float32)
    w8 = jax.random.uniform(keys[2], (hidden_dim, out_dim),
                            minval=-stdv_o, maxval=stdv_o, dtype=jnp.float32)
    b8 = jax.random.uniform(keys[3], (out_dim,),
                            minval=-stdv_o, maxval=stdv_o, dtype=jnp.float32)
    return w_stack, b_stack, w8, b8


def _make_adj(key, n):
    a = (jax.random.uniform(key, (n, n)) < 0.3).astype(jnp.float32)
    a = jnp.maximum(a, a.T) + jnp.eye(n, dtype=jnp.float32)
    return a / jnp.sum(a, axis=1, keepdims=True)


if __name__ == "__main__":
    key = jax.random.PRNGKey(0)
    k_x, k_a, k_p, k_x2, k_a2 = jax.random.split(key, 5)

    N, IN_DIM, HIDDEN, OUT_DIM = 16, 8, 32, 4

    x = jax.random.normal(k_x, (N, IN_DIM), dtype=jnp.float32)
    adj = _make_adj(k_a, N)
    params = init_params(k_p, IN_DIM, HIDDEN, OUT_DIM)

    # Small-N fused path.
    out = gcn_forward(x, adj, params)
    jax.block_until_ready(out)

    # Plain-JAX f32 reference with the original per-branch structure.
    w_stack, b_stack, w8, b8 = params
    ref_h = jnp.zeros((N, HIDDEN), jnp.float32)
    for i in range(7):
        ref_h = ref_h + adj @ (x @ w_stack[i]) + b_stack[i]
    ref_h = jnp.maximum(ref_h, 0.0)
    ref_out = adj @ (ref_h @ w8) + b8
    assert out.shape == (N, OUT_DIM)
    # Tolerance covers bf16 operand rounding + MXU pass precision.
    assert jnp.allclose(out, ref_out, atol=2e-2, rtol=2e-2)

    # Large-N tiled path: small demo shapes that still exercise a (4, 2) grid
    # (row-parallel axis + K-accumulation with the f32 scratch).
    N2 = 512
    x2 = jax.random.normal(k_x2, (N2, IN_DIM), dtype=jnp.float32)
    adj2 = _make_adj(k_a2, N2)
    w_sum = jnp.sum(w_stack, axis=0)
    b_sum = jnp.sum(b_stack, axis=0)
    out2 = gcn_forward_tiled(x2, adj2, w_sum, b_sum, w8, b8,
                             row_tile=128, k_tile=256)
    jax.block_until_ready(out2)
    ref_h2 = jnp.maximum(adj2 @ (x2 @ w_sum) + b_sum, 0.0)
    ref_out2 = adj2 @ (ref_h2 @ w8) + b8
    assert out2.shape == (N2, OUT_DIM)
    assert jnp.allclose(out2, ref_out2, atol=2e-2, rtol=2e-2)

    print("KERNEL_OK")
</pallas_src>

<mosaic_0001>
module attributes {stable_mosaic.version = 11 : i64} {
  func.func @_gcn_fused_kernel(%arg0: i32, %arg1: memref<16x128xbf16, #tpu.memory_space<vmem>>, %arg2: memref<16x16xbf16, #tpu.memory_space<vmem>>, %arg3: memref<128x128xbf16, #tpu.memory_space<vmem>>, %arg4: memref<1x128xf32, #tpu.memory_space<vmem>>, %arg5: memref<128x128xbf16, #tpu.memory_space<vmem>>, %arg6: memref<1x128xf32, #tpu.memory_space<vmem>>, %arg7: memref<16x128xf32, #tpu.memory_space<vmem>>) attributes {dimension_semantics = [#tpu.dimension_semantics<arbitrary>], iteration_bounds = array<i64: 1>, scalar_prefetch = 0 : i64, scratch_operands = 0 : i64, tpu.core_type = #tpu.core_type<tc>, window_params = [{pipeline_mode = #tpu.pipeline_mode<synchronous>, transform_indices = @transform_0, window_bounds = array<i64: 16, 128>}, {pipeline_mode = #tpu.pipeline_mode<synchronous>, transform_indices = @transform_1, window_bounds = array<i64: 16, 16>}, {pipeline_mode = #tpu.pipeline_mode<synchronous>, transform_indices = @transform_2, window_bounds = array<i64: 128, 128>}, {pipeline_mode = #tpu.pipeline_mode<synchronous>, transform_indices = @transform_3, window_bounds = array<i64: 1, 128>}, {pipeline_mode = #tpu.pipeline_mode<synchronous>, transform_indices = @transform_4, window_bounds = array<i64: 128, 128>}, {pipeline_mode = #tpu.pipeline_mode<synchronous>, transform_indices = @transform_5, window_bounds = array<i64: 1, 128>}, {pipeline_mode = #tpu.pipeline_mode<synchronous>, transform_indices = @transform_6, window_bounds = array<i64: 16, 128>}]} {
    %c0 = arith.constant 0 : index
    %c0_0 = arith.constant 0 : index
    %0 = vector.load %arg2[%c0, %c0_0] : memref<16x16xbf16, #tpu.memory_space<vmem>>, vector<16x16xbf16>
    %c0_1 = arith.constant 0 : index
    %c0_2 = arith.constant 0 : index
    %1 = vector.load %arg1[%c0_1, %c0_2] : memref<16x128xbf16, #tpu.memory_space<vmem>>, vector<16x128xbf16>
    %c0_3 = arith.constant 0 : index
    %c0_4 = arith.constant 0 : index
    %2 = vector.load %arg3[%c0_3, %c0_4] : memref<128x128xbf16, #tpu.memory_space<vmem>>, vector<128x128xbf16>
    %cst = arith.constant dense<0.000000e+00> : vector<16x128xf32>
    %3 = tpu.matmul %1, %2, %cst {dimension_numbers = #tpu.dot_dimension_numbers<[1], [0], [0], [1], [0, 0, 1, 1], [], []>} : vector<16x128xbf16>, vector<128x128xbf16>, vector<16x128xf32> -> vector<16x128xf32>
    %4 = arith.truncf %3 : vector<16x128xf32> to vector<16x128xbf16>
    %cst_5 = arith.constant dense<0.000000e+00> : vector<16x128xf32>
    %5 = tpu.matmul %0, %4, %cst_5 {dimension_numbers = #tpu.dot_dimension_numbers<[1], [0], [0], [1], [0, 0, 1, 1], [], []>} : vector<16x16xbf16>, vector<16x128xbf16>, vector<16x128xf32> -> vector<16x128xf32>
    %c0_6 = arith.constant 0 : index
    %c0_7 = arith.constant 0 : index
    %6 = vector.load %arg4[%c0_6, %c0_7] : memref<1x128xf32, #tpu.memory_space<vmem>>, vector<1x128xf32>
    %7 = vector.broadcast %6 : vector<1x128xf32> to vector<16x128xf32>
    %8 = arith.addf %5, %7 : vector<16x128xf32>
    %cst_8 = arith.constant 0.000000e+00 : f32
    %9 = vector.broadcast %cst_8 : f32 to vector<16x128xf32>
    %10 = arith.maximumf %8, %9 : vector<16x128xf32>
    %11 = arith.truncf %10 : vector<16x128xf32> to vector<16x128xbf16>
    %c0_9 = arith.constant 0 : index
    %c0_10 = arith.constant 0 : index
    %12 = vector.load %arg5[%c0_9, %c0_10] : memref<128x128xbf16, #tpu.memory_space<vmem>>, vector<128x128xbf16>
    %cst_11 = arith.constant dense<0.000000e+00> : vector<16x128xf32>
    %13 = tpu.matmul %11, %12, %cst_11 {dimension_numbers = #tpu.dot_dimension_numbers<[1], [0], [0], [1], [0, 0, 1, 1], [], []>} : vector<16x128xbf16>, vector<128x128xbf16>, vector<16x128xf32> -> vector<16x128xf32>
    %14 = arith.truncf %13 : vector<16x128xf32> to vector<16x128xbf16>
    %cst_12 = arith.constant dense<0.000000e+00> : vector<16x128xf32>
    %15 = tpu.matmul %0, %14, %cst_12 {dimension_numbers = #tpu.dot_dimension_numbers<[1], [0], [0], [1], [0, 0, 1, 1], [], []>} : vector<16x16xbf16>, vector<16x128xbf16>, vector<16x128xf32> -> vector<16x128xf32>
    %c0_13 = arith.constant 0 : index
    %c0_14 = arith.constant 0 : index
    %16 = vector.load %arg6[%c0_13, %c0_14] : memref<1x128xf32, #tpu.memory_space<vmem>>, vector<1x128xf32>
    %17 = vector.broadcast %16 : vector<1x128xf32> to vector<16x128xf32>
    %18 = arith.addf %15, %17 : vector<16x128xf32>
    %c0_15 = arith.constant 0 : index
    %c0_16 = arith.constant 0 : index
    %19 = vector.load %arg7[%c0_15, %c0_16] : memref<16x128xf32, #tpu.memory_space<vmem>>, vector<16x128xf32>
    tpu.vector_store %arg7[%c0_15, %c0_16], %18 {strides = array<i32>} : memref<16x128xf32, #tpu.memory_space<vmem>>, vector<16x128xf32>,
    return
  }
  func.func @transform_0(%arg0: i32) -> (i32, i32) {
    %c0_i32 = arith.constant 0 : i32
    %c0_i32_0 = arith.constant 0 : i32
    %c0_i32_1 = arith.constant 0 : i32
    return %c0_i32, %c0_i32_0 : i32, i32
  }
  func.func @transform_1(%arg0: i32) -> (i32, i32) {
    %c0_i32 = arith.constant 0 : i32
    %c0_i32_0 = arith.constant 0 : i32
    %c0_i32_1 = arith.constant 0 : i32
    return %c0_i32, %c0_i32_0 : i32, i32
  }
  func.func @transform_2(%arg0: i32) -> (i32, i32) {
    %c0_i32 = arith.constant 0 : i32
    %c0_i32_0 = arith.constant 0 : i32
    %c0_i32_1 = arith.constant 0 : i32
    return %c0_i32, %c0_i32_0 : i32, i32
  }
  func.func @transform_3(%arg0: i32) -> (i32, i32) {
    %c0_i32 = arith.constant 0 : i32
    %c0_i32_0 = arith.constant 0 : i32
    %c0_i32_1 = arith.constant 0 : i32
    return %c0_i32, %c0_i32_0 : i32, i32
  }
  func.func @transform_4(%arg0: i32) -> (i32, i32) {
    %c0_i32 = arith.constant 0 : i32
    %c0_i32_0 = arith.constant 0 : i32
    %c0_i32_1 = arith.constant 0 : i32
    return %c0_i32, %c0_i32_0 : i32, i32
  }
  func.func @transform_5(%arg0: i32) -> (i32, i32) {
    %c0_i32 = arith.constant 0 : i32
    %c0_i32_0 = arith.constant 0 : i32
    %c0_i32_1 = arith.constant 0 : i32
    return %c0_i32, %c0_i32_0 : i32, i32
  }
  func.func @transform_6(%arg0: i32) -> (i32, i32) {
    %c0_i32 = arith.constant 0 : i32
    %c0_i32_0 = arith.constant 0 : i32
    %c0_i32_1 = arith.constant 0 : i32
    return %c0_i32, %c0_i32_0 : i32, i32
  }
}

</mosaic_0001>

<bundles_post_ra>
// kernel: gcn_forward.1
= control target key start
LH: loop header
LB: loop body
LE: loop exit
PB: predicated region body
PF: predicated region fallthrough
CT: control target
= control target key end

     0   :  { %vm122_vm0 = vcmask 130048   ;;  %s443_s2 = inlined_call_operand.vmem [shape: bf16[128,128], index: 2, kind: input, shape index: {}]   ;;  %s444_s0 = inlined_call_operand.vmem [shape: bf16[16,128], index: 0, kind: input, shape index: {}]   ;;  %s445_s3 = inlined_call_operand.vmem [shape: f32[1,128], index: 3, kind: input, shape index: {}]   ;;  %s446_s4 = inlined_call_operand.vmem [shape: bf16[128,128], index: 4, kind: input, shape index: {}]   ;;  %s447_s1 = inlined_call_operand.vmem [shape: bf16[16,16], index: 1, kind: input, shape index: {}]   ;;  %s448_s5 = inlined_call_operand.vmem [shape: f32[1,128], index: 5, kind: input, shape index: {}]   ;;  %s449_s6 = inlined_call_operand.vmem [shape: f32[16,128], index: 6, kind: output, shape index: {}]  }
   0x1   :  { %v329_v0 = vld [vmem:[%s443_s2 + $0x38] sm:$0xff]  ;;  %v328_v1 = vld [vmem:[%s443_s2 + $0x30] sm:$0xff]  ;;  %v327_v2 = vld [vmem:[%s443_s2 + $0x28] sm:$0xff] }
   0x2   :  { %98 = vmatpush.bf16.msra.mxu0 %v329_v0  ;;  %v326_v3 = vld [vmem:[%s443_s2 + $0x20] sm:$0xff]  ;;  %v325_v4 = vld [vmem:[%s443_s2 + $0x18] sm:$0xff]  ;;  %v324_v5 = vld [vmem:[%s443_s2 + $0x10] sm:$0xff] }
   0x3   :  { %v323_v6 = vld [vmem:[%s443_s2 + $0x8] sm:$0xff]  ;;  %v322_v7 = vld [vmem:[%s443_s2] sm:$0xff]  ;;  %v337_v9 = vld [vmem:[%s446_s4 + $0x38] sm:$0xff] }
   0x4   :  { %v321_v8 = vld [vmem:[%s444_s0] sm:$0xff]  ;;  %207 = vmatpush.bf16.msra.mxu2 %v337_v9  ;;  %v336_v10 = vld [vmem:[%s446_s4 + $0x30] sm:$0xff]  ;;  %v335_v11 = vld [vmem:[%s446_s4 + $0x28] sm:$0xff] }
   0x5   :  { %v334_v12 = vld [vmem:[%s446_s4 + $0x20] sm:$0xff]  ;;  %v333_v17 = vld [vmem:[%s446_s4 + $0x18] sm:$0xff]  ;;  %v332_v18 = vld [vmem:[%s446_s4 + $0x10] sm:$0xff] }
   0x6   :  { %99 = vmatpush.bf16.msra.mxu0 %v328_v1  ;;  %v320_v16 = vld [vmem:[%s447_s1] sm:$0xff]  ;;  %v331_v19 = vld [vmem:[%s446_s4 + $0x8] sm:$0xff] }
   0x7   :  { %v330_v20 = vld [vmem:[%s446_s4] sm:$0xff] }
   0x8   :  { %208 = vmatpush.bf16.msra.mxu2 %v336_v10  ;;  %v338_v22 = vld [vmem:[%s445_s3] ss:$0 sm:$0xff] }
   0x9   :  { %v339_v32 = vld [vmem:[%s448_s5] ss:$0 sm:$0xff] }
   0xa   :  { %100 = vmatpush.bf16.msra.mxu0 %v327_v2 }
   0xc   :  { %209 = vmatpush.bf16.msra.mxu2 %v335_v11 }
   0xe   :  { %101 = vmatpush.bf16.msra.mxu0 %v326_v3 }
  0x10   :  { %210 = vmatpush.bf16.msra.mxu2 %v334_v12 }
  0x12   :  { %102 = vmatpush.bf16.msra.mxu0 %v325_v4 }
  0x14   :  { %211 = vmatpush.bf16.msra.mxu2 %v333_v17 }
  0x16   :  { %103 = vmatpush.bf16.msra.mxu0 %v324_v5 }
  0x18   :  { %212 = vmatpush.bf16.msra.mxu2 %v332_v18 }
  0x1a   :  { %104 = vmatpush.bf16.msra.mxu0 %v323_v6 }
  0x1c   :  { %213 = vmatpush.bf16.msra.mxu2 %v331_v19 }
  0x1e   :  { %105 = vmatpush.bf16.msra.mxu0 %v322_v7 }
  0x20   :  { %214 = vmatpush.bf16.msra.mxu2 %v330_v20 }
  0x21   :  { %106 = vmatmul.bf16.vlgmr.msra.gmra.mxu0 %v321_v8 }
  0x9e   :  { %v107_v13 = vpop.f32.mrf.mxu0 }
  0xa6   :  { %v109_v14 = vpop.f32.mrf.mxu0 }
  0xa7   :  { %v112_v15 = vpack.c.bf16 %v109_v14, %v107_v13 }
  0xa9   :  { %133 = vmatpush.bf16.msra.mxu1 %v112_v15 }
  0xac   :  { %286 = vmatmul.msk.bf16.vlgmr.msra.gmra.mxu1 %vm122_vm0, %v320_v16 }
 0x129   :  { %v135_v21 = vpop.f32.mrf.mxu1 }
 0x12a   :  { %v136_v23 = vadd.f32 %v338_v22, %v135_v21 }
 0x12c   :  { %v140_v26 = vmax.f32 %v136_v23, 0.0 }
 0x131   :  { %v137_v24 = vpop.f32.mrf.mxu1 }
 0x132   :  { %v138_v25 = vadd.f32 %v338_v22, %v137_v24 }
 0x134   :  { %v141_v27 = vmax.f32 %v138_v25, 0.0 }
 0x136   :  { %v142_v28 = vpack.c.bf16 %v141_v27, %v140_v26 }
 0x138   :  { %215 = vmatmul.bf16.vlgmr.msra.gmra.mxu2 %v142_v28 }
 0x1bb   :  { %v216_v29 = vpop.f32.mrf.mxu2 }
 0x1c3   :  { %v218_v30 = vpop.f32.mrf.mxu2 }
 0x1c4   :  { %v221_v31 = vpack.c.bf16 %v218_v30, %v216_v29 }
 0x1c6   :  { %233 = vmatpush.bf16.msra.mxu3 %v221_v31 }
 0x1c9   :  { %319 = vmatmul.msk.bf16.vlgmr.msra.gmra.mxu3 %vm122_vm0, %v320_v16 }
 0x24c   :  { %v235_v33 = vpop.f32.mrf.mxu3 }
 0x24d   :  { %v236_v34 = vadd.f32 %v339_v32, %v235_v33 }
 0x24f   :  { %240 = vst [vmem:[%s449_s6] sm:$0xff] %v236_v34 }
 0x254   :  { %v237_v35 = vpop.f32.mrf.mxu3 }
 0x255   :  { %v238_v36 = vadd.f32 %v339_v32, %v237_v35 }
 0x257   :  { %241 = vst [vmem:[%s449_s6 + $0x8] sm:$0xff] %v238_v36 }

</bundles_post_ra>
